<compile_context>
chip_gen: v5e
topology: v5e:2x2
jax: 0.10.0
libtpu: 0.0.40
codegen_flags: <defaults>
</compile_context>

<pallas_src>
import math
import functools

import jax
import jax.numpy as jnp
from jax import lax
from jax.experimental import pallas as pl
from jax.experimental.pallas import tpu as pltpu


def _round_up(x, m):
    return ((x + m - 1) // m) * m


def _largest_dividing_tile(dim_rounded, cap):
    """Largest multiple of 128 that divides `dim_rounded` (a multiple of 128)
    and is <= cap. Falls back to 128."""
    cap = max(128, min(cap, dim_rounded))
    t = (cap // 128) * 128
    while t > 128:
        if dim_rounded % t == 0:
            return t
        t -= 128
    return 128


def _epilogue(acc_f32, b_row, *, scale, lr_mul, activation, negative_slope,
              act_scale, out_dtype):
    # Fold the equalized-lr scale into the epilogue (commutes with the matmul).
    out = acc_f32 * scale + b_row.astype(jnp.float32) * lr_mul
    if activation:
        out = jnp.where(out >= 0, out, negative_slope * out) * act_scale
    return out.astype(out_dtype)


def _equal_linear_kernel_single_k(x_ref, w_ref, b_ref, o_ref, *, scale, lr_mul,
                                  activation, negative_slope, act_scale):
    # x_ref: [tm, K]   w_ref: [tn, K] (PyTorch layout)   b_ref: [1, tn]
    # NT contraction on the MXU: contract the last dim of both operands.
    acc = lax.dot_general(
        x_ref[...], w_ref[...],
        dimension_numbers=(((1,), (1,)), ((), ())),
        preferred_element_type=jnp.float32)
    o_ref[...] = _epilogue(acc, b_ref[...], scale=scale, lr_mul=lr_mul,
                           activation=activation,
                           negative_slope=negative_slope,
                           act_scale=act_scale, out_dtype=o_ref.dtype)


def _equal_linear_kernel_multi_k(x_ref, w_ref, b_ref, o_ref, acc_ref, *, scale,
                                 lr_mul, activation, negative_slope, act_scale):
    # x_ref: [tm, tk]   w_ref: [tn, tk]   b_ref: [1, tn]   o_ref: [tm, tn]
    k = pl.program_id(2)
    prod = lax.dot_general(
        x_ref[...], w_ref[...],
        dimension_numbers=(((1,), (1,)), ((), ())),
        preferred_element_type=jnp.float32)

    @pl.when(k == 0)
    def _():
        acc_ref[...] = prod          # direct write: no zero-fill + RMW

    @pl.when(k > 0)
    def _():
        acc_ref[...] += prod

    @pl.when(k == pl.num_programs(2) - 1)
    def _():
        o_ref[...] = _epilogue(acc_ref[...], b_ref[...], scale=scale,
                               lr_mul=lr_mul, activation=activation,
                               negative_slope=negative_slope,
                               act_scale=act_scale, out_dtype=o_ref.dtype)


def equal_linear(x, weight, bias, *, lr_mul=1.0, activation=None,
                 compute_dtype=jnp.bfloat16, tm=256, tn=512, tk=1024,
                 vmem_budget_bytes=20 * 1024 * 1024):
    """Pallas implementation of _EqualLinear.forward.

    x:      [..., in_dim]
    weight: [out_dim, in_dim]   (PyTorch convention, consumed untransposed)
    bias:   [out_dim]
    """
    out_dim, in_dim = weight.shape
    scale = (1.0 / math.sqrt(in_dim)) * lr_mul

    orig_shape = x.shape
    out_dtype = x.dtype
    x2d = x.reshape(-1, in_dim)
    B = x2d.shape[0]

    # Feed the MXU narrow operands; accumulate & apply the epilogue in f32.
    if compute_dtype is not None and x2d.dtype != compute_dtype:
        x2d = x2d.astype(compute_dtype)
    w = weight
    if compute_dtype is not None and w.dtype != compute_dtype:
        w = w.astype(compute_dtype)
    b = bias.astype(jnp.float32).reshape(1, out_dim)

    in_itemsize = jnp.dtype(x2d.dtype).itemsize
    w_itemsize = jnp.dtype(w.dtype).itemsize
    out_itemsize = jnp.dtype(out_dtype).itemsize
    # dtype-native sublane count: 8 for f32, 16 for bf16, 32 for int8/fp8.
    sublane = max(8, 32 // in_itemsize)

    Mr = _round_up(B, sublane)
    Nr = _round_up(out_dim, 128)
    Kr = _round_up(in_dim, 128)

    tm = _round_up(min(tm, Mr), sublane)
    # If the M grid has a single block, split N so a v7x megacore gets >= 2
    # parallel blocks (one per TensorCore).
    tn_cap = tn
    if Mr <= tm and Nr >= 256:
        tn_cap = min(tn_cap, Nr // 2)
    tn = _largest_dividing_tile(Nr, tn_cap)
    tk = _largest_dividing_tile(Kr, tk)

    # Cap the double-buffered VMEM footprint (pipeline bufs + f32 accumulator).
    def _footprint(tm_, tn_, tk_):
        return (2 * (tm_ * tk_ * in_itemsize + tk_ * tn_ * w_itemsize
                     + tm_ * tn_ * out_itemsize) + tm_ * tn_ * 4)

    while _footprint(tm, tn, tk) > vmem_budget_bytes:
        if tk > 128:
            tk = _largest_dividing_tile(Kr, tk - 128)
        elif tn > 128:
            tn = _largest_dividing_tile(Nr, tn - 128)
        elif tm > sublane:
            tm = max(sublane, _round_up(tm // 2, sublane))
        else:
            break

    Bp = _round_up(B, tm)
    Np = _round_up(out_dim, tn)
    Kp = _round_up(in_dim, tk)

    # Zero-pad to tile multiples. K zero-padding is load-bearing: it keeps the
    # reduction exact (padded terms contribute 0); padded M/N rows/cols are
    # sliced off below. Output last dim stays a multiple of 128 (lane-dense).
    if (Bp, Kp) != (B, in_dim):
        x2d = jnp.pad(x2d, ((0, Bp - B), (0, Kp - in_dim)))
    if (Np, Kp) != (out_dim, in_dim):
        w = jnp.pad(w, ((0, Np - out_dim), (0, Kp - in_dim)))
    if Np != out_dim:
        b = jnp.pad(b, ((0, 0), (0, Np - out_dim)))

    common = dict(scale=scale, lr_mul=lr_mul, activation=bool(activation),
                  negative_slope=0.2, act_scale=2.0 ** 0.5)
    kdims = Kp // tk

    if kdims == 1:
        # Common StyleGAN mapping-net case: no accumulator scratch, no phases.
        kernel = functools.partial(_equal_linear_kernel_single_k, **common)
        grid_spec = pltpu.PrefetchScalarGridSpec(
            num_scalar_prefetch=0,
            grid=(Bp // tm, Np // tn),
            in_specs=[
                pl.BlockSpec((tm, tk), lambda i, j: (i, 0)),   # x tile
                pl.BlockSpec((tn, tk), lambda i, j: (j, 0)),   # W tile (N-major)
                pl.BlockSpec((1, tn), lambda i, j: (0, j)),    # bias tile
            ],
            out_specs=pl.BlockSpec((tm, tn), lambda i, j: (i, j)),
        )
        semantics = ("parallel", "parallel")
    else:
        kernel = functools.partial(_equal_linear_kernel_multi_k, **common)
        grid_spec = pltpu.PrefetchScalarGridSpec(
            num_scalar_prefetch=0,
            grid=(Bp // tm, Np // tn, kdims),
            in_specs=[
                pl.BlockSpec((tm, tk), lambda i, j, k: (i, k)),
                pl.BlockSpec((tn, tk), lambda i, j, k: (j, k)),
                pl.BlockSpec((1, tn), lambda i, j, k: (0, j)),
            ],
            out_specs=pl.BlockSpec((tm, tn), lambda i, j, k: (i, j)),
            scratch_shapes=[pltpu.VMEM((tm, tn), jnp.float32)],
        )
        semantics = ("parallel", "parallel", "arbitrary")

    out = pl.pallas_call(
        kernel,
        out_shape=jax.ShapeDtypeStruct((Bp, Np), out_dtype),
        grid_spec=grid_spec,
        compiler_params=pltpu.CompilerParams(
            dimension_semantics=semantics,
            vmem_limit_bytes=32 * 1024 * 1024),
    )(x2d, w, b)

    out = out[:B, :out_dim]
    return out.reshape(*orig_shape[:-1], out_dim)


def _reference(x, weight, bias, *, lr_mul=1.0, activation=None,
               compute_dtype=None):
    """Pure-JAX reference. With compute_dtype set, it mimics the kernel's
    'narrow operands, f32 accumulation' semantics for a tight comparison."""
    in_dim = weight.shape[1]
    scale = (1.0 / math.sqrt(in_dim)) * lr_mul
    xf = x.astype(jnp.float32)
    wf = weight.astype(jnp.float32)
    if compute_dtype is not None:
        xf = xf.astype(compute_dtype).astype(jnp.float32)
        wf = wf.astype(compute_dtype).astype(jnp.float32)
    out = (xf @ wf.T) * scale + bias.astype(jnp.float32) * lr_mul
    if activation:
        out = jnp.where(out >= 0, out, 0.2 * out) * (2.0 ** 0.5)
    return out.astype(x.dtype)


if __name__ == "__main__":
    key = jax.random.PRNGKey(0)
    k_x, k_w, k_x2, k_w2, k_b2, k_x3 = jax.random.split(key, 6)

    # --- Small mapping-net-style layer (lr_mul=0.01, zero bias) -------------
    batch, in_dim, out_dim = 8, 32, 32
    lr_mul = 0.01
    x = jax.random.normal(k_x, (batch, in_dim), dtype=jnp.float32)
    weight = jax.random.normal(k_w, (out_dim, in_dim), dtype=jnp.float32) / lr_mul
    bias = jnp.zeros((out_dim,), dtype=jnp.float32)

    out_lin = jax.block_until_ready(
        equal_linear(x, weight, bias, lr_mul=lr_mul, activation=None))
    out_act = jax.block_until_ready(
        equal_linear(x, weight, bias, lr_mul=lr_mul, activation="fused_lrelu"))

    ref_lin_bf = _reference(x, weight, bias, lr_mul=lr_mul, activation=None,
                            compute_dtype=jnp.bfloat16)
    ref_act_bf = _reference(x, weight, bias, lr_mul=lr_mul,
                            activation="fused_lrelu",
                            compute_dtype=jnp.bfloat16)
    ref_lin_f32 = _reference(x, weight, bias, lr_mul=lr_mul, activation=None)
    ref_act_f32 = _reference(x, weight, bias, lr_mul=lr_mul,
                             activation="fused_lrelu")

    assert out_lin.shape == (batch, out_dim)
    assert out_act.shape == (batch, out_dim)
    # Tight check against the matched-precision (bf16 operands, f32 acc) ref.
    assert jnp.allclose(out_lin, ref_lin_bf, atol=2e-3, rtol=2e-3)
    assert jnp.allclose(out_act, ref_act_bf, atol=2e-3, rtol=2e-3)
    # Loose sanity check against the pure-f32 PyTorch-equivalent math.
    assert jnp.allclose(out_lin, ref_lin_f32, atol=5e-2, rtol=5e-2)
    assert jnp.allclose(out_act, ref_act_f32, atol=5e-2, rtol=5e-2)

    # --- 3-D input (latent-code style), exercises the reshape path ----------
    x3 = jax.random.normal(k_x3, (2, 3, in_dim), dtype=jnp.float32)
    out3 = jax.block_until_ready(
        equal_linear(x3, weight, bias, lr_mul=lr_mul, activation="fused_lrelu"))
    ref3 = _reference(x3.reshape(-1, in_dim), weight, bias, lr_mul=lr_mul,
                      activation="fused_lrelu",
                      compute_dtype=jnp.bfloat16).reshape(2, 3, out_dim)
    assert out3.shape == (2, 3, out_dim)
    assert jnp.allclose(out3, ref3, atol=2e-3, rtol=2e-3)

    # --- Odd sizes: multi-K-step accumulation + M/N/K padding ---------------
    B2, K2, N2 = 48, 384, 320
    x2 = jax.random.normal(k_x2, (B2, K2), dtype=jnp.float32)
    w2 = jax.random.normal(k_w2, (N2, K2), dtype=jnp.float32)
    b2 = jax.random.normal(k_b2, (N2,), dtype=jnp.float32)

    out2 = jax.block_until_ready(
        equal_linear(x2, w2, b2, lr_mul=1.0, activation="fused_lrelu", tk=128))
    ref2_bf = _reference(x2, w2, b2, lr_mul=1.0, activation="fused_lrelu",
                         compute_dtype=jnp.bfloat16)
    assert out2.shape == (B2, N2)
    assert jnp.allclose(out2, ref2_bf, atol=5e-3, rtol=5e-3)

    print("KERNEL_OK")
</pallas_src>

<mosaic_0001>
module attributes {stable_mosaic.version = 11 : i64} {
  func.func @_equal_linear_kernel_single_k(%arg0: i32, %arg1: i32, %arg2: memref<16x128xbf16, #tpu.memory_space<vmem>>, %arg3: memref<128x128xbf16, #tpu.memory_space<vmem>>, %arg4: memref<1x128xf32, #tpu.memory_space<vmem>>, %arg5: memref<16x128xf32, #tpu.memory_space<vmem>>) attributes {dimension_semantics = [#tpu.dimension_semantics<parallel>, #tpu.dimension_semantics<parallel>], iteration_bounds = array<i64: 1, 1>, scalar_prefetch = 0 : i64, scratch_operands = 0 : i64, tpu.core_type = #tpu.core_type<tc>, window_params = [{transform_indices = @transform_0, window_bounds = array<i64: 16, 128>}, {transform_indices = @transform_1, window_bounds = array<i64: 128, 128>}, {transform_indices = @transform_2, window_bounds = array<i64: 1, 128>}, {transform_indices = @transform_3, window_bounds = array<i64: 16, 128>}]} {
    %c0 = arith.constant 0 : index
    %c0_0 = arith.constant 0 : index
    %0 = vector.load %arg2[%c0, %c0_0] : memref<16x128xbf16, #tpu.memory_space<vmem>>, vector<16x128xbf16>
    %c0_1 = arith.constant 0 : index
    %c0_2 = arith.constant 0 : index
    %1 = vector.load %arg3[%c0_1, %c0_2] : memref<128x128xbf16, #tpu.memory_space<vmem>>, vector<128x128xbf16>
    %cst = arith.constant dense<0.000000e+00> : vector<16x128xf32>
    %2 = tpu.matmul %0, %1, %cst {dimension_numbers = #tpu.dot_dimension_numbers<[1], [1], [0], [0], [0, 0, 1, 0], [], []>} : vector<16x128xbf16>, vector<128x128xbf16>, vector<16x128xf32> -> vector<16x128xf32>
    %c0_3 = arith.constant 0 : index
    %c0_4 = arith.constant 0 : index
    %3 = vector.load %arg4[%c0_3, %c0_4] : memref<1x128xf32, #tpu.memory_space<vmem>>, vector<1x128xf32>
    %cst_5 = arith.constant 0.00176776689 : f32
    %4 = vector.broadcast %cst_5 : f32 to vector<16x128xf32>
    %5 = arith.mulf %2, %4 : vector<16x128xf32>
    %cst_6 = arith.constant 0.00999999977 : f32
    %6 = vector.broadcast %cst_6 : f32 to vector<1x128xf32>
    %7 = arith.mulf %3, %6 : vector<1x128xf32>
    %8 = vector.broadcast %7 : vector<1x128xf32> to vector<16x128xf32>
    %9 = arith.addf %5, %8 : vector<16x128xf32>
    %c0_7 = arith.constant 0 : index
    %c0_8 = arith.constant 0 : index
    %10 = vector.load %arg5[%c0_7, %c0_8] : memref<16x128xf32, #tpu.memory_space<vmem>>, vector<16x128xf32>
    tpu.vector_store %arg5[%c0_7, %c0_8], %9 {strides = array<i32>} : memref<16x128xf32, #tpu.memory_space<vmem>>, vector<16x128xf32>,
    return
  }
  func.func @transform_0(%arg0: i32, %arg1: i32) -> (i32, i32) {
    %c0_i32 = arith.constant 0 : i32
    %c0_i32_0 = arith.constant 0 : i32
    return %arg0, %c0_i32 : i32, i32
  }
  func.func @transform_1(%arg0: i32, %arg1: i32) -> (i32, i32) {
    %c0_i32 = arith.constant 0 : i32
    %c0_i32_0 = arith.constant 0 : i32
    return %arg1, %c0_i32 : i32, i32
  }
  func.func @transform_2(%arg0: i32, %arg1: i32) -> (i32, i32) {
    %c0_i32 = arith.constant 0 : i32
    %c0_i32_0 = arith.constant 0 : i32
    return %c0_i32, %arg1 : i32, i32
  }
  func.func @transform_3(%arg0: i32, %arg1: i32) -> (i32, i32) {
    %c0_i32 = arith.constant 0 : i32
    return %arg0, %arg1 : i32, i32
  }
}

</mosaic_0001>

<bundles_post_ra>
// kernel: tpu_custom_call.1
= control target key start
LH: loop header
LB: loop body
LE: loop exit
PB: predicated region body
PF: predicated region fallthrough
CT: control target
= control target key end

     0   :  { %8 = vsyncpa [#allocation3], 0  ;;  %s333_s0 = inlined_call_operand.hbm [shape: bf16[16,128], index: 0, kind: input, shape index: {}]   ;;  %s334_s1 = inlined_call_operand.hbm [shape: bf16[128,128], index: 1, kind: input, shape index: {}]   ;;  %s335_s2 = inlined_call_operand.vmem [shape: f32[1,128], index: 2, kind: input, shape index: {}]   ;;  %s336_s3 = inlined_call_operand.hbm [shape: f32[16,128], index: 3, kind: output, shape index: {}]  }
   0x1   :  { %9 = vsyncpa [#allocation6], 0 }
   0x2   :  { %10 = vsyncpa [#allocation4], 0  ;;  %s15_s14 = sshll.u32 %s333_s0, 4  ;;  %s294_s15 = smov [#allocation2]   ;;  %s16_s14 = int_to_ptr.hbm [resolvable:$true] %s15_s14 }
   0x3   :  { %s17_s16 = sshll.u32 %s294_s15, 4  ;;  %s28_s19 = sshll.u32 %s334_s1, 4  ;;  %s18_s16 = int_to_ptr.vmem [resolvable:$true] %s17_s16  ;;  %s29_s19 = int_to_ptr.hbm [resolvable:$true] %s28_s19 }
   0x4   :  { %s295_s20 = smov 64   ;;  %s296_s21 = smov 4  }
   0x5   :  { %23 = dma.hbm_to_vmem [thread:$0]  %s16_s14, 128, %s18_s16, [#allocation3], %s295_s20, %s295_s20, %s296_s21  }
   0x6   :  { %s297_s22 = smov [#allocation5]  }
   0x7   :  { %s30_s23 = sshll.u32 %s297_s22, 4  ;;  %s31_s23 = int_to_ptr.vmem [resolvable:$true] %s30_s23 }
   0x8   :  { %36 = dma.hbm_to_vmem [thread:$0]  %s29_s19, 1024, %s31_s23, [#allocation6], %s295_s20, %s295_s20, %s296_s21  }
   0x9   :  { %288 = dma.done.wait [#allocation3], 128  }
   0xa   :  { %289 = vsyncadd [#allocation3], 4294967168 }
   0xb   :  { %290 = dma.done.wait [#allocation6], 1024  }
   0xc   :  { %291 = vsyncadd [#allocation6], 4294966272  ;;  %v208_v0 = vld [vmem:[#allocation5 + $0x38] sm:$0xff]  ;;  %v207_v1 = vld [vmem:[#allocation5 + $0x30] sm:$0xff]  ;;  %s298_s24 = smov [#allocation7]   ;;  %s150_s28 = sshll.u32 %s336_s3, 4  ;;  %s151_s28 = int_to_ptr.hbm [resolvable:$true] %s150_s28 }
   0xd   :  { %119 = vmatpush.bf16.xpose.msra.mxu0 %v208_v0  ;;  %v206_v2 = vld [vmem:[#allocation5 + $0x28] sm:$0xff]  ;;  %v205_v3 = vld [vmem:[#allocation5 + $0x20] sm:$0xff]  ;;  %v204_v4 = vld [vmem:[#allocation5 + $0x18] sm:$0xff]  ;;  %s148_s25 = sshll.u32 %s298_s24, 4  ;;  %s299_s29 = smov 128   ;;  %s149_s25 = int_to_ptr.vmem [resolvable:$true] %s148_s25 }
   0xe   :  { %v203_v5 = vld [vmem:[#allocation5 + $0x10] sm:$0xff]  ;;  %v202_v6 = vld [vmem:[#allocation5 + $0x8] sm:$0xff]  ;;  %v201_v7 = vld [vmem:[#allocation5] sm:$0xff] }
   0xf   :  { %v200_v8 = vld [vmem:[#allocation2] sm:$0xff] }
  0x10   :  { %v133_v9 = vld [vmem:[%s335_s2] sm:$0x1]  ;;  %s300_s2 = smov 8  }
  0x11   :  { %v136_v10 = vmul.f32 0.01, %v133_v9 }
  0x13   :  { %v138_v11 = vperm.slane %v136_v10, 0 }
  0x15   :  { %120 = vmatpush.bf16.xpose.msra.mxu0 %v207_v1 }
  0x1d   :  { %121 = vmatpush.bf16.xpose.msra.mxu0 %v206_v2 }
  0x25   :  { %122 = vmatpush.bf16.xpose.msra.mxu0 %v205_v3 }
  0x2d   :  { %123 = vmatpush.bf16.xpose.msra.mxu0 %v204_v4 }
  0x35   :  { %124 = vmatpush.bf16.xpose.msra.mxu0 %v203_v5 }
  0x3d   :  { %125 = vmatpush.bf16.xpose.msra.mxu0 %v202_v6 }
  0x45   :  { %126 = vmatpush.bf16.xpose.msra.mxu0 %v201_v7 }
  0x4c   :  { %127 = vmatmul.bf16.vlgmr.msra.gmra.mxu0 %v200_v8 }
  0xc9   :  { %v128_v12 = vpop.f32.mrf.mxu0 }
  0xca   :  { %v134_v13 = vmul.f32 0.0017677669, %v128_v12 }
  0xcc   :  { %v140_v14 = vadd.f32 %v138_v11, %v134_v13 }
  0xce   :  { %142 = vst [vmem:[#allocation7] sm:$0xff] %v140_v14 }
  0xd1   :  { %v130_v15 = vpop.f32.mrf.mxu0 }
  0xd2   :  { %v135_v16 = vmul.f32 0.0017677669, %v130_v15 }
  0xd4   :  { %v141_v17 = vadd.f32 %v138_v11, %v135_v16 }
  0xd6   :  { %143 = vst [vmem:[#allocation7 + $0x8] sm:$0xff] %v141_v17 }
  0xd7   :  { %156 = dma.vmem_to_hbm [thread:$0]  %s149_s25, 256, %s151_s28, [#allocation4], %s299_s29, %s299_s29, %s300_s2  }
  0xd8   :  { %292 = dma.done.wait [#allocation4], 256  }
  0xd9   :  { %293 = vsyncadd [#allocation4], 4294967040 }
  0xda   :  { %161 = vsyncpa [#allocation3], 1 }
  0xdb   :  { %162 = vsyncpa [#allocation6], 1 }
  0xdc   :  { %163 = vsyncpa [#allocation4], 1 }

</bundles_post_ra>
